<compile_context>
chip_gen: v6e
topology: v6e:2x2x1
jax: 0.10.0
libtpu: 0.0.40
codegen_flags: <defaults>
</compile_context>

<pallas_src>
import jax
import jax.numpy as jnp
import numpy as np
from jax.experimental import pallas as pl
from jax.experimental.pallas import tpu as pltpu


_VMEM_TILE_BUDGET = 30 * 1024 * 1024   # budget used for tile selection (all TPU gens)
_VMEM_LIMIT_BYTES = 40 * 1024 * 1024   # scoped-VMEM cap handed to Mosaic (< v7x 64 MiB)


def _round_up(v, m):
    return ((v + m - 1) // m) * m


# ---------------------------------------------------------------------------
# Host-side precompute: normalized 'area' (adaptive-average) interpolation weights.
#   start_l = floor(l * L_in / L_out), end_l = ceil((l + 1) * L_in / L_out)
#   W[i, l] = 1 / (end_l - start_l)  if start_l <= i < end_l  else 0
# ---------------------------------------------------------------------------
def _area_weight_matrix(l_in, l_out, dtype):
    i = np.arange(l_in)[:, None]
    l = np.arange(l_out)[None, :]
    start = (l * l_in) // l_out
    end = -(-((l + 1) * l_in) // l_out)                  # ceil division (exact, int64)
    hit = (i >= start) & (i < end)
    w = hit.astype(np.float64) / (end - start).astype(np.float64)
    return jnp.asarray(w.astype(np.float32)).astype(dtype)


# ---------------------------------------------------------------------------
# Kernels. Shapes per grid step:
#   x_ref:    (1, TC, L_in)     w_ref: (L_in, TLo)
#   beta_ref: (1, 1, L_in)      m*_ref: (1, 1, TLo)      o_ref: (1, TC, TLo)
# ---------------------------------------------------------------------------
def _unpool_kernel(x_ref, w_ref, o_ref):
    x = x_ref[0].astype(w_ref.dtype)                               # (TC, L_in)
    up = jnp.dot(x, w_ref[...], preferred_element_type=jnp.float32)
    o_ref[0] = up.astype(o_ref.dtype)


def _unpool_blend_kernel(x_ref, w_ref, m_ref, o_ref):
    x = x_ref[0].astype(w_ref.dtype)
    up = jnp.dot(x, w_ref[...], preferred_element_type=jnp.float32)
    m = jnp.clip(m_ref[0].astype(jnp.float32), 0.0, 1.0)           # (1, TLo)
    o_ref[0] = (up * m + up * (1.0 - m)).astype(o_ref.dtype)       # faithful torch rounding


def _unpool_tuple_kernel(x_ref, w_ref, beta_ref, m0_ref, m1_ref, o_ref):
    x = x_ref[0].astype(w_ref.dtype)                               # (TC, L_in)
    beta = beta_ref[0].astype(w_ref.dtype)                         # (1, L_in) (NOT clamped)
    w = w_ref[...]
    base = jnp.dot(x, w, preferred_element_type=jnp.float32)       # interp(x)
    x1 = jnp.dot(x * beta, w, preferred_element_type=jnp.float32)  # interp(x * beta)
    x2 = base - x1                                                 # interp(x * (1 - beta))
    m0 = jnp.clip(m0_ref[0].astype(jnp.float32), 0.0, 1.0)
    m1 = jnp.clip(m1_ref[0].astype(jnp.float32), 0.0, 1.0)
    o_ref[0] = (x1 * m0 + x2 * m1).astype(o_ref.dtype)


# ---------------------------------------------------------------------------
# Tile selection: lane tile multiple of 128 (or full extent), sublane tile multiple of 8
# (or full extent), largest combination that fits the VMEM budget (double-buffers counted).
# ---------------------------------------------------------------------------
def _divisor_tiles(extent, align, targets):
    cands = []
    if extent % align == 0:
        for t in targets:
            t = min(t, extent)
            t = (t // align) * align
            while t > 0 and extent % t != 0:
                t -= align
            if t > 0 and t not in cands:
                cands.append(t)
    if extent not in cands:
        cands.append(extent)
    cands.sort(reverse=True)
    return cands


def _choose_tiles(C, L_in, L_out, x_bytes, o_bytes, w_bytes):
    tc_cands = _divisor_tiles(C, 8, (256, 128, 64, 32, 16, 8))
    tlo_cands = _divisor_tiles(L_out, 128, (4096, 2048, 1024, 512, 256, 128))
    lin_lane = _round_up(L_in, 128)
    lin_sub = _round_up(L_in, 8)
    for t_c in tc_cands:                      # prefer big M (MXU fill), then big N
        for t_lo in tlo_cands:                # t_lo == L_out => W DMA'd from HBM only once
            tcp = _round_up(t_c, 8)
            tlp = _round_up(t_lo, 128)
            est = (2 * tcp * lin_lane * x_bytes        # x block (double buffered)
                   + 2 * tcp * tlp * o_bytes           # out block
                   + 2 * lin_sub * tlp * w_bytes       # weight block
                   + 6 * 8 * tlp * 4                   # masks (generous)
                   + 2 * 8 * lin_lane * 4)             # beta
            if est <= _VMEM_TILE_BUDGET:
                return t_c, t_lo
    # TODO(synk): add a K-axis (L_in) grid dimension with an f32 accumulator for inputs so
    # long that even the minimal tiles exceed the budget.
    return tc_cands[-1], tlo_cands[-1]


def _as_batched_row(a, B, n, name):
    """Normalize to (Bm, 1, n) with Bm in {1, B}; never broadcast over batch in HBM."""
    a = jnp.asarray(a)
    if a.ndim == 1:
        a = a[None, :]
    if a.ndim == 3:
        if a.shape[1] != 1:
            raise NotImplementedError(f"{name}: per-channel values are not supported")
        a = a[:, 0, :]
    if a.ndim != 2 or a.shape[-1] != n or a.shape[0] not in (1, B):
        raise ValueError(f"{name} has unsupported shape {tuple(a.shape)}")
    return a.reshape(a.shape[0], 1, n)


# ---------------------------------------------------------------------------
# Wrapper
# ---------------------------------------------------------------------------
def adaunpool1d(x, mask=None, interpolate=True, faithful_blend=False):
    """JAX/Pallas port of adaunpool() (interpolate=True path) for x of shape (B, C, L_in).

    faithful_blend: the single-mask torch code computes up*clamp(m) + up*(1-clamp(m)), which
    is algebraically `up`; by default the redundant mask stream/blend is elided.  Pass True
    to reproduce the exact floating-point rounding of the torch expression.
    """
    assert mask is not None, 'Function called with `None`/undefined `mask` parameter.'
    assert interpolate, "TODO(synk): interpolate=False branches not implemented"

    B, C, L_in = x.shape
    is_tuple = isinstance(mask, (tuple, list))
    L_out = int(jnp.asarray(mask[0] if is_tuple else mask).shape[-1])

    compute_dtype = jnp.bfloat16 if x.dtype == jnp.bfloat16 else jnp.float32
    x_bytes = jnp.dtype(x.dtype).itemsize
    w_bytes = jnp.dtype(compute_dtype).itemsize
    t_c, t_lo = _choose_tiles(C, L_in, L_out, x_bytes, x_bytes, w_bytes)
    grid = (B, C // t_c, L_out // t_lo)

    # Normalized area weights, built once on host. With t_lo == L_out its block index is
    # constant over the whole grid -> HBM read happens exactly once (DMA elided afterwards).
    W = _area_weight_matrix(L_in, L_out, compute_dtype)

    x_spec = pl.BlockSpec((1, t_c, L_in), lambda b, c, l: (b, c, 0))
    w_spec = pl.BlockSpec((L_in, t_lo), lambda b, c, l: (0, l))
    out_spec = pl.BlockSpec((1, t_c, t_lo), lambda b, c, l: (b, c, l))
    out_shape = jax.ShapeDtypeStruct((B, C, L_out), x.dtype)
    cparams = pltpu.CompilerParams(
        dimension_semantics=("parallel", "parallel", "arbitrary"),
        vmem_limit_bytes=_VMEM_LIMIT_BYTES)

    def _row_spec(arr, n):
        if arr.shape[0] == B:
            return pl.BlockSpec((1, 1, n), lambda b, c, l: (b, 0, l))
        return pl.BlockSpec((1, 1, n), lambda b, c, l: (0, 0, l))

    if is_tuple:
        assert len(mask) == 3, "tuple mask must be (mask_edscw, mask_em, beta)"
        m0 = _as_batched_row(mask[0], B, L_out, "mask_edscw")
        m1 = _as_batched_row(mask[1], B, L_out, "mask_em")
        beta = _as_batched_row(mask[2], B, L_in, "beta")
        if beta.shape[0] == B:
            beta_spec = pl.BlockSpec((1, 1, L_in), lambda b, c, l: (b, 0, 0))
        else:
            beta_spec = pl.BlockSpec((1, 1, L_in), lambda b, c, l: (0, 0, 0))
        return pl.pallas_call(
            _unpool_tuple_kernel,
            out_shape=out_shape,
            grid=grid,
            in_specs=[x_spec, w_spec, beta_spec, _row_spec(m0, L_out), _row_spec(m1, L_out)],
            out_specs=out_spec,
            compiler_params=cparams,
        )(x, W, beta, m0, m1)

    if faithful_blend:
        m = _as_batched_row(mask, B, L_out, "mask")
        return pl.pallas_call(
            _unpool_blend_kernel,
            out_shape=out_shape,
            grid=grid,
            in_specs=[x_spec, w_spec, _row_spec(m, L_out)],
            out_specs=out_spec,
            compiler_params=cparams,
        )(x, W, m)

    return pl.pallas_call(
        _unpool_kernel,
        out_shape=out_shape,
        grid=grid,
        in_specs=[x_spec, w_spec],
        out_specs=out_spec,
        compiler_params=cparams,
    )(x, W)


class AdaUnpool1d:
    """Mirror of the PyTorch AdaUnpool1d module (forward: adaunpool(x, mask=self.mask)).

    The original __init__ references undefined kernel_size/stride (bug in the reference
    source); only the mask is actually used, so only it is kept here."""

    def __init__(self, mask=None):
        assert mask is not None, '`mask` cannot be `None`!'
        self.mask = mask

    def __call__(self, x):
        return adaunpool1d(x, mask=self.mask)


# ---------------------------------------------------------------------------
# Pure-JAX/XLA reference (mirrors torch adaunpool, interpolate=True) for verification.
# ---------------------------------------------------------------------------
def _adaunpool1d_reference(x, mask):
    B, C, L_in = x.shape
    xf = x.astype(jnp.float32)
    hi = jax.lax.Precision.HIGHEST
    if isinstance(mask, (tuple, list)):
        L_out = int(jnp.asarray(mask[0]).shape[-1])
        W = _area_weight_matrix(L_in, L_out, jnp.float32)
        m0 = jnp.clip(jnp.broadcast_to(jnp.asarray(mask[0]), (B, L_out)).astype(jnp.float32),
                      0.0, 1.0)[:, None, :]
        m1 = jnp.clip(jnp.broadcast_to(jnp.asarray(mask[1]), (B, L_out)).astype(jnp.float32),
                      0.0, 1.0)[:, None, :]
        beta = jnp.broadcast_to(jnp.asarray(mask[2]), (B, L_in)).astype(jnp.float32)[:, None, :]
        x1 = jnp.einsum('bcl,lo->bco', xf * beta, W, precision=hi)
        x2 = jnp.einsum('bcl,lo->bco', xf * (1.0 - beta), W, precision=hi)
        out = x1 * m0 + x2 * m1
    else:
        L_out = int(jnp.asarray(mask).shape[-1])
        W = _area_weight_matrix(L_in, L_out, jnp.float32)
        m = jnp.clip(jnp.broadcast_to(jnp.asarray(mask), (B, L_out)).astype(jnp.float32),
                     0.0, 1.0)[:, None, :]
        up = jnp.einsum('bcl,lo->bco', xf, W, precision=hi)
        out = up * m + up * (1.0 - m)
    return out.astype(x.dtype)


if __name__ == "__main__":
    key = jax.random.PRNGKey(0)
    B, C, L_in = 2, 8, 64
    k1, k2, k3, k4, k5, k6 = jax.random.split(key, 6)
    x = jax.random.normal(k1, (B, C, L_in), dtype=jnp.float32)

    # --- single-mask path, integer-ratio upsample (L_out = 2 * L_in, lane-aligned) ---
    L_out = 128
    mask = jax.random.uniform(k2, (B, L_out), dtype=jnp.float32, minval=-0.2, maxval=1.2)
    unpool = AdaUnpool1d(mask=mask)
    y = jax.block_until_ready(unpool(x))
    y_ref = _adaunpool1d_reference(x, mask)
    assert y.shape == (B, C, L_out), y.shape
    assert jnp.allclose(y, y_ref, atol=1e-5, rtol=1e-5), float(jnp.max(jnp.abs(y - y_ref)))

    # Also exercise the faithful (bit-matching blend) variant of the single-mask path.
    y2 = jax.block_until_ready(adaunpool1d(x, mask=mask, faithful_blend=True))
    assert jnp.allclose(y2, y_ref, atol=1e-5, rtol=1e-5), float(jnp.max(jnp.abs(y2 - y_ref)))

    # --- single-mask path, non-integer ratio (exercises the averaging weights) ---
    L_out_b = 96
    mask_b = jax.random.uniform(k3, (B, L_out_b), dtype=jnp.float32)
    yb = jax.block_until_ready(adaunpool1d(x, mask=mask_b))
    yb_ref = _adaunpool1d_reference(x, mask_b)
    assert yb.shape == (B, C, L_out_b), yb.shape
    assert jnp.allclose(yb, yb_ref, atol=1e-5, rtol=1e-5), float(jnp.max(jnp.abs(yb - yb_ref)))

    # --- tuple-mask path (EDSCW / EM masks + beta, as produced by AdaPool1d(return_mask=True)) ---
    m_edscw = jax.random.uniform(k4, (B, L_out), dtype=jnp.float32)
    m_em = jax.random.uniform(k5, (B, L_out), dtype=jnp.float32)
    beta = jax.random.uniform(k6, (L_in,), dtype=jnp.float32)
    unpool_t = AdaUnpool1d(mask=(m_edscw, m_em, beta))
    yt = jax.block_until_ready(unpool_t(x))
    yt_ref = _adaunpool1d_reference(x, (m_edscw, m_em, beta))
    assert yt.shape == (B, C, L_out), yt.shape
    assert jnp.allclose(yt, yt_ref, atol=1e-5, rtol=1e-5), float(jnp.max(jnp.abs(yt - yt_ref)))

    print("KERNEL_OK")
</pallas_src>

<mosaic_0001>
module attributes {stable_mosaic.version = 11 : i64} {
  func.func @_unpool_kernel(%arg0: i32, %arg1: i32, %arg2: i32, %arg3: memref<1x8x64xf32, #tpu.memory_space<vmem>>, %arg4: memref<64x128xf32, #tpu.memory_space<vmem>>, %arg5: memref<1x8x128xf32, #tpu.memory_space<vmem>>) attributes {dimension_semantics = [#tpu.dimension_semantics<parallel>, #tpu.dimension_semantics<parallel>, #tpu.dimension_semantics<arbitrary>], iteration_bounds = array<i64: 2, 1, 1>, scalar_prefetch = 0 : i64, scratch_operands = 0 : i64, tpu.core_type = #tpu.core_type<tc>, window_params = [{transform_indices = @transform_0, window_bounds = array<i64: 1, 8, 64>}, {transform_indices = @transform_1, window_bounds = array<i64: 64, 128>}, {transform_indices = @transform_2, window_bounds = array<i64: 1, 8, 128>}]} {
    %c0 = arith.constant 0 : index
    %c0_0 = arith.constant 0 : index
    %c0_1 = arith.constant 0 : index
    %0 = vector.load %arg3[%c0, %c0_0, %c0_1] : memref<1x8x64xf32, #tpu.memory_space<vmem>>, vector<1x8x64xf32>
    %1 = vector.shape_cast %0 : vector<1x8x64xf32> to vector<8x64xf32>
    %c0_2 = arith.constant 0 : index
    %c0_3 = arith.constant 0 : index
    %2 = vector.load %arg4[%c0_2, %c0_3] : memref<64x128xf32, #tpu.memory_space<vmem>>, vector<64x128xf32>
    %cst = arith.constant dense<0.000000e+00> : vector<8x128xf32>
    %3 = tpu.matmul %1, %2, %cst {dimension_numbers = #tpu.dot_dimension_numbers<[1], [0], [0], [1], [0, 0, 1, 1], [], []>} : vector<8x64xf32>, vector<64x128xf32>, vector<8x128xf32> -> vector<8x128xf32>
    %c0_4 = arith.constant 0 : index
    %c0_5 = arith.constant 0 : index
    %c0_6 = arith.constant 0 : index
    %4 = vector.load %arg5[%c0_4, %c0_5, %c0_6] : memref<1x8x128xf32, #tpu.memory_space<vmem>>, vector<1x8x128xf32>
    %5 = vector.shape_cast %4 : vector<1x8x128xf32> to vector<8x128xf32>
    %6 = vector.shape_cast %3 : vector<8x128xf32> to vector<1x8x128xf32>
    tpu.vector_store %arg5[%c0_4, %c0_5, %c0_6], %6 {strides = array<i32>} : memref<1x8x128xf32, #tpu.memory_space<vmem>>, vector<1x8x128xf32>,
    return
  }
  func.func @transform_0(%arg0: i32, %arg1: i32, %arg2: i32) -> (i32, i32, i32) {
    %c0_i32 = arith.constant 0 : i32
    %c0_i32_0 = arith.constant 0 : i32
    return %arg0, %arg1, %c0_i32 : i32, i32, i32
  }
  func.func @transform_1(%arg0: i32, %arg1: i32, %arg2: i32) -> (i32, i32) {
    %c0_i32 = arith.constant 0 : i32
    %c0_i32_0 = arith.constant 0 : i32
    return %c0_i32, %arg2 : i32, i32
  }
  func.func @transform_2(%arg0: i32, %arg1: i32, %arg2: i32) -> (i32, i32, i32) {
    %c0_i32 = arith.constant 0 : i32
    return %arg0, %arg1, %arg2 : i32, i32, i32
  }
}

</mosaic_0001>

<bundles_post_ra>
// kernel: tpu_custom_call.1
= control target key start
LH: loop header
LB: loop body
LE: loop exit
PB: predicated region body
PF: predicated region fallthrough
CT: control target
= control target key end

     0   :  { %7 = vsyncpa [#allocation3], 0  ;;  %s869_s0 = inlined_call_operand.hbm [shape: f32[2,8,64], index: 0, kind: input, shape index: {}]   ;;  %s870_s1 = inlined_call_operand.hbm [shape: f32[64,128], index: 1, kind: input, shape index: {}]   ;;  %s871_s2 = inlined_call_operand.hbm [shape: f32[2,8,128], index: 2, kind: output, shape index: {}]  }
   0x1   :  { %9 = vsyncpa [#allocation3 + $0x1], 0 }
   0x2   :  { %10 = vsyncpa [#allocation6], 0 }
   0x3   :  { %11 = vsyncpa [#allocation4], 0 }
   0x4   :  { %13 = vsyncpa [#allocation4 + $0x1], 0  ;;  %s686_s9 = smov 0   ;;  %s688_s10 = smov 0  }
   0x5   :  { %s690_s11 = smov 0   ;;  %s692_s12 = smov 0  }
   0x6   :  { %s694_s13 = smov 0   ;;  %s696_s14 = smov 0  }
   0x7 LB: > { %s403_s15 = sadd.s32 4294967295, %s662_s14   ;;  %s404_s16 = sadd.s32 4294967294, %s662_s14   ;;  %s662_s14 = sphi %s696_s14, %s19_s14   ;;  %s658_s13 = sphi %s694_s13, %s889_s13   ;;  %s654_s12 = sphi %s692_s12, %s888_s12   ;;  %s650_s11 = sphi %s690_s11, %s887_s11   ;;  %s646_s10 = sphi %s688_s10, %s886_s10   ;;  %s642_s9 = sphi %s686_s9, %s885_s9  }
   0x8   : > { %p60_p0 = scmp.ne.s32.totalorder %s646_s10, %s642_s9  ;;  %p720_p1 = scmp.eq.s32.totalorder %s403_s15, 0 }
   0x9   : > { %p724_p2 = scmp.eq.s32.totalorder %s403_s15, 1  ;;  %p120_p3 = scmp.eq.s32.totalorder %s404_s16, 1 }
   0xa   : > { %p730_p4 = por %p720_p1, %p60_p0  ;;  %p405_p5 = scmp.ge.s32.totalorder %s662_s14, 1 }
   0xb   : > { %p735_p6 = por %p120_p3, %p60_p0  ;;  %p127_p7 = scmp.lt.s32.totalorder %s662_s14, 3 }
   0xc   : > { %s875_s19 = scalar_select %p730_p4, 1, 0 }
   0xd   : > { %s876_s20 = scalar_select %p735_p6, 1, 0 }
   0xe   : > { %p740_p8 = pnand %p405_p5, %p127_p7  ;;  %s664_s22 = smov [#allocation5]  }
   0xf   : > { %s141_s23 = sshll.u32 %s664_s22, 4  ;;  %s38_s25 = sadd.s32 1, %s658_s13  ;;  %s142_s23 = int_to_ptr.vmem [resolvable:$true] %s141_s23 }
  0x10   : > { %p455_p9 = pneg %p740_p8  ;;  %s535_s26 = scalar_lea.vmem %s142_s23, 1024 }
  0x11   : > { %p536_p13 = scmp.ne.s32.totalorder %s142_s23, %s535_s26  ;;  %p543_p5 = scmp.lt.s32.totalorder %s142_s23, %s142_s23 }
  0x12   : > { %p749_p11 = pnand %p455_p9, %p720_p1  ;;  %p544_p7 = scmp.lt.s32.totalorder %s535_s26, %s535_s26 }
  0x14   : > { %p526_p12 = pneg %p749_p11  ;;  %p545_p6 = por %p544_p7, %p543_p5 }
  0x16   : > { %p538_p0 = pnand %p536_p13, %p526_p12 }
  0x18   : > { %p539_p3 = pneg %p538_p0 }
  0x1a   : > { %p546_p4 = pnand %p545_p6, %p539_p3 }
  0x1c   : > { %549 = shalt.err (!%p546_p4)
}
  0x1d   : > { %s665_s27 = smov 128   ;;  %s666_s28 = smov 8  }
  0x1e   : > { %458 = dma.hbm_to_vmem [thread:$0]  (!%p749_p11), %s870_s1, 1024, %s142_s23, [#allocation6], %s665_s27, %s665_s27, %s666_s28  }
  0x1f   : > { %p40_p6 = scmp.ge.s32.totalorder %s38_s25, 2  ;;  %s47_s3 = sadd.s32 1, %s650_s11 }
  0x20   : > { %p54_p4 = scmp.ne.s32.totalorder %s650_s11, %s646_s10  ;;  %p55_p9 = scmp.eq.s32.totalorder %s662_s14, 0 }
  0x21   : > { %s891_s25 = smov (%p40_p6, %s38_s25), 0  ;;  %p468_p0 = scmp.lt.s32.totalorder %s662_s14, 2 }
  0x22   : > { %p767_p12 = por %p55_p9, %p54_p4  ;;  %p773_p13 = por %p724_p2, %p54_p4 }
  0x23   : > { %s42_s6 = ssub.s32 %s658_s13, %s891_s25  ;;  %s155_s7 = sand.u32 1, %s650_s11  }
  0x24   : > { %p45_p11 = scmp.eq.s32.totalorder %s42_s6, 0  ;;  %s408_s8 = sshll.u32 %s155_s7, 3 }
  0x25   : > { %s409_s16 = sshll.u32 %s658_s13, 7  ;;  %s159_s26 = scalar_lea.vmem [#allocation2], %s408_s8 }
  0x26   : > { %s782_s15 = scalar_select %p45_p11, %s650_s11, %s47_s3  }
  0x27   : > { %s165_s24 = scalar_lea.hbm %s869_s0, %s409_s16  ;;  %s167_s27 = sshll.u32 %s159_s26, 4  ;;  %s168_s27 = int_to_ptr.vmem [resolvable:$true] %s167_s27 }
  0x28   : > { %p790_p2 = pnand %p468_p0, %p767_p12  ;;  %s156_s28 = scalar_lea.sflag [#allocation3], %s155_s7 }
  0x29   : > { %s563_s29 = scalar_lea.vmem %s168_s27, 128  ;;  %s667_s30 = smov [#allocation2]  }
  0x2a   : > { %p552_p3 = pneg %p790_p2  ;;  %p564_p5 = scmp.ne.s32.totalorder %s168_s27, %s563_s29 }
  0x2b   : > { %s568_s3 = sshll.u32 %s667_s30, 4  ;;  %s569_s3 = int_to_ptr.vmem [resolvable:$false] %s568_s3 }
  0x2c   : > { %p566_p7 = pnand %p564_p5, %p552_p3  ;;  %s570_s6 = scalar_lea.vmem %s569_s3, 256 }
  0x2d   : > { %p571_p4 = scmp.lt.s32.totalorder %s168_s27, %s569_s3  ;;  %p572_p9 = scmp.lt.s32.totalorder %s570_s6, %s563_s29 }
  0x2e   : > { %p567_p6 = pneg %p566_p7 }
  0x2f   : > { %p573_p11 = por %p572_p9, %p571_p4 }
  0x31   : > { %p574_p10 = pnand %p573_p11, %p567_p6 }
  0x33   : > { %577 = shalt.err (!%p574_p10)
}
  0x34   : > { %462 = dma.hbm_to_vmem [thread:$0]  (!%p790_p2), %s165_s24, 128, %s168_s27, %s156_s28  }
  0x35   : > { %176 = sbr.rel (%p740_p8) target bundleno = 285 (0x11d), region = 28  ;;  %s801_s4 = sand.u32 (!%p740_p8), 1, %s646_s10  }
  0x36   : > { %s411_s7 = sshll.u32 (!%p740_p8), %s801_s4, 3  ;;  %s179_s8 = scalar_lea.sflag (!%p740_p8), [#allocation3], %s801_s4 }
  0x37   : > { %s182_s16 = scalar_lea.vmem (!%p740_p8), [#allocation2], %s411_s7  ;;  %p882_p12 = scmp.ne.s32.totalorder (!%p740_p8), %s875_s19, 0 }
  0x3a   : > { %629 = dma.done.wait (%p882_p12), %s179_s8, 128  }
  0x3b   : > { %631 = vsyncadd (%p882_p12), %s179_s8, 4294967168 }
  0x3c   : > { %633 = dma.done.wait (%p720_p1), [#allocation6], 1024  }
  0x3d   : > { %635 = vsyncadd (%p720_p1), [#allocation6], 4294966272  ;;  %v668_v0 = vmov 0.0   ;;  %vm669_vm0 = vmmov 0   ;;  %v215_v1 = vld [vmem:[#allocation5 + $0x38] sm:$0xff]  ;;  %v214_v2 = vld [vmem:[#allocation5 + $0x30] sm:$0xff] }
  0x3e   : > { %428 = vmatprep.subr.mxu0 %v668_v0  ;;  %444 = vmatprep.mubr.msk.f32.mxu0 %vm669_vm0, %v668_v0  ;;  %v213_v3 = vld [vmem:[#allocation5 + $0x28] sm:$0xff]  ;;  %v212_v4 = vld [vmem:[#allocation5 + $0x20] sm:$0xff]  ;;  %v211_v5 = vld [vmem:[#allocation5 + $0x18] sm:$0xff]  ;;  %vm216_vm1 = vcmask 523264   ;;  %s206_s17 = scalar_lea.vmem [#allocation7], %s411_s7  ;;  %s416_s21 = sshll.u32 %s654_s12, 7 }
  0x3f   : > { %429 = vmatpush3.msra.mxu0 %v215_v1  ;;  %v210_v6 = vld [vmem:[#allocation5 + $0x10] sm:$0xff]  ;;  %v209_v7 = vld [vmem:[#allocation5 + $0x8] sm:$0xff]  ;;  %v208_v8 = vld [vmem:[#allocation5] sm:$0xff]  ;;  %s307_s19 = sshll.u32 %s206_s17, 4  ;;  %s823_s24 = scalar_lea.hbm %s871_s2, %s416_s21  ;;  %s818_s19 = int_to_ptr.vmem [resolvable:$true] %s307_s19 }
  0x40   : > { %430 = vmatprep.subr.mxu0 %v668_v0  ;;  %v207_v9 = vld [vmem:[%s182_s16] sm:$0xff]  ;;  %s292_s26 = scalar_lea.sflag [#allocation4], %s801_s4  ;;  %s578_s27 = scalar_lea.vmem %s818_s19, 128 }
  0x41   : > { %431 = vmatpush3.msra.mxu0 %v214_v2  ;;  %p579_p1 = scmp.ne.s32.totalorder %s818_s19, %s578_s27  ;;  %s670_s12 = smov [#allocation7]  }
  0x42   : > { %432 = vmatprep.subr.mxu0 %v668_v0  ;;  %s582_s18 = sshll.u32 %s670_s12, 4  ;;  %s583_s18 = int_to_ptr.vmem [resolvable:$false] %s582_s18 }
  0x43   : > { %433 = vmatpush3.msra.mxu0 %v213_v3  ;;  %p580_p8 = pnand %p579_p1, %p773_p13  ;;  %s584_s28 = scalar_lea.vmem %s583_s18, 256 }
  0x44   : > { %434 = vmatprep.subr.mxu0 %v668_v0  ;;  %p585_p0 = scmp.lt.s32.totalorder %s818_s19, %s583_s18  ;;  %p586_p2 = scmp.lt.s32.totalorder %s584_s28, %s578_s27 }
  0x45   : > { %435 = vmatpush3.msra.mxu0 %v212_v4  ;;  %p581_p10 = pneg %p580_p8 }
  0x46   : > { %436 = vmatprep.subr.mxu0 %v668_v0  ;;  %p587_p3 = por %p586_p2, %p585_p0 }
  0x47   : > { %437 = vmatpush3.msra.mxu0 %v211_v5 }
  0x48   : > { %438 = vmatprep.subr.mxu0 %v668_v0  ;;  %p588_p5 = pnand %p587_p3, %p581_p10 }
  0x49   : > { %439 = vmatpush3.msra.mxu0 %v210_v6 }
  0x4a   : > { %440 = vmatprep.subr.mxu0 %v668_v0 }
  0x4b   : > { %441 = vmatpush3.msra.mxu0 %v209_v7 }
  0x4c   : > { %442 = vmatprep.subr.mxu0 %v668_v0 }
  0x4d   : > { %443 = vmatpush3.msra.mxu0 %v208_v8 }
  0x4e   : > { %445 = vmatmul.mubr.msk.f32.vlgmr.msra.gmra.mxu0 %vm216_vm1, %v207_v9 }
 0x10e   : > { %v286_v10 = vpop.f32.mrf.mxu0 }
 0x10f   : > { %290 = vst [vmem:[%s206_s17] sm:$0xff] %v286_v10 }
 0x110   : > { %v446_v11 = vpop.f32.mrf.mxu0 }
 0x111   : > { %591 = shalt.err (!%p588_p5)
}
 0x112   : > { %s592_s29 = scalar_lea.hbm %s823_s24, 128  ;;  %s596_s6 = scalar_lea.hbm %s871_s2, 256 }
 0x113   : > { %p593_p7 = scmp.ne.s32.totalorder %s823_s24, %s592_s29  ;;  %p597_p9 = scmp.lt.s32.totalorder %s823_s24, %s871_s2 }
 0x114   : > { %p598_p11 = scmp.lt.s32.totalorder %s596_s6, %s592_s29 }
 0x115   : > { %p594_p6 = pnand %p593_p7, %p773_p13 }
 0x116   : > { %p599_p12 = por %p598_p11, %p597_p9 }
 0x117   : > { %p595_p4 = pneg %p594_p6 }
 0x119   : > { %p600_p1 = pnand %p599_p12, %p595_p4 }
 0x11b   : > { %603 = shalt.err (!%p600_p1)
}
 0x11c   : > { %453 = dma.vmem_to_hbm [thread:$0]  (%p773_p13), %s818_s19, 128, %s823_s24, %s292_s26  }
 0x11d PF: > { %s319_s8 = sand.u32 1, %s642_s9   ;;  %p883_p8 = scmp.ne.s32.totalorder %s876_s20, 0 }
 0x11e   : > { %p884_p10 = scmp.ge.s32.totalorder %s662_s14, 2  ;;  %s320_s16 = scalar_lea.sflag [#allocation4], %s319_s8 }
 0x120   : > { %p464_p0 = pnand %p884_p10, %p883_p8 }
 0x122   : > { %p465_p2 = pneg %p464_p0 }
 0x124   : > { %637 = dma.done.wait (%p465_p2), %s320_s16, 128  }
 0x125   : > { %639 = vsyncadd (%p465_p2), %s320_s16, 4294967168  ;;  %s19_s14 = sadd.s32 1, %s662_s14   ;;  %s885_s9 = smov %s646_s10 }
 0x126   : > { %p16_p3 = scmp.ge.s32.totalorder %s19_s14, 4   ;;  %s886_s10 = smov %s650_s11 }
 0x127   : > { %s887_s11 = smov %s782_s15  ;;  %s888_s12 = smov %s658_s13 }
 0x128   : > { %s889_s13 = smov %s891_s25  ;;  %18 = sbr.rel (!%p16_p3) target bundleno = 7 (0x7), region = 78 }
 0x12d   :  { %325 = vsyncpa [#allocation3], 1 }
 0x12e   :  { %327 = vsyncpa [#allocation3 + $0x1], 1 }
 0x12f   :  { %328 = vsyncpa [#allocation6], 1 }
 0x130   :  { %329 = vsyncpa [#allocation4], 1 }
 0x131   :  { %331 = vsyncpa [#allocation4 + $0x1], 1 }

</bundles_post_ra>
